<compile_context>
chip_gen: v7x
topology: tpu7x:2x2x1
jax: 0.10.0
libtpu: 0.0.40
codegen_flags: <defaults>
</compile_context>

<pallas_src>
import math

import jax
import jax.numpy as jnp
from jax.experimental import pallas as pl
from jax.experimental.pallas import tpu as pltpu

LANE = 128
SUBLANE = 8
TILE_R = 2048  # rows per grid step: 2048*128*4 B = 1 MiB per f32 buffer

# --- fused sincos constants (Cody-Waite split of pi/2 + cephes f32 minimax polys) ---
_TWO_OVER_PI = 0.6366197723675814
_PIO2_HI = 1.5703125
_PIO2_MID = 4.837512969970703125e-4
_PIO2_LO = 7.549789948768648e-8


def _sincos(x):
    """Fused sin/cos of an f32 array.

    One shared range reduction (n = round(x*2/pi), r = x - n*pi/2 via a 3-term
    Cody-Waite subtraction), two minimax polynomials sharing z = r*r, and quadrant
    fix-up with selects.  Everything is VPU work (mul/add/select) plus a couple of
    int32 bit ops; no transcendental unit involved.  Accurate to a few f32 ulps for
    |x| up to ~1e4, far tighter than the 1e-5 test tolerance.
    """
    n_f = jnp.floor(x * _TWO_OVER_PI + 0.5)           # round-to-nearest quadrant index
    r = x - n_f * _PIO2_HI
    r = r - n_f * _PIO2_MID
    r = r - n_f * _PIO2_LO
    z = r * r
    sin_r = ((-1.9515295891e-4 * z + 8.3321608736e-3) * z - 1.6666654611e-1) * z * r + r
    cos_r = ((2.443315711809948e-5 * z - 1.388731625493765e-3) * z
             + 4.166664568298827e-2) * z * z - 0.5 * z + 1.0

    q = n_f.astype(jnp.int32)
    swap = (q & 1) == 1                                # odd quadrant: swap sin/cos
    s = jnp.where(swap, cos_r, sin_r)
    c = jnp.where(swap, sin_r, cos_r)
    sin_neg = (q & 2) == 2                             # quadrants 2,3: sin < 0
    cos_neg = ((q + 1) & 2) == 2                       # quadrants 1,2: cos < 0
    sin_x = jnp.where(sin_neg, -s, s)
    cos_x = jnp.where(cos_neg, -c, c)
    return sin_x, cos_x


def _collapse_kernel(m_ref, phi_ref, re_ref, im_ref):
    # Cast in-register after the load -- the wrapper never up-casts in HBM, so bf16
    # inputs pay half the read bandwidth.
    m = m_ref[...].astype(jnp.float32)
    phi = phi_ref[...].astype(jnp.float32)
    sin_phi, cos_phi = _sincos(phi)
    re_ref[...] = m * cos_phi
    im_ref[...] = m * sin_phi


def _pick_tile_r(rows: int) -> int:
    """Rows per grid step: big enough to amortize per-step overhead, small enough to
    keep >= ~4 grid steps so a v7x megacore can shard the row axis across both TCs."""
    if rows <= SUBLANE:
        return rows                      # full-extent block (always legal)
    quarter = (rows // 4) // SUBLANE * SUBLANE
    return max(SUBLANE, min(TILE_R, quarter))


def _collapse_planes_2d(m2d: jax.Array, phi2d: jax.Array):
    """Run the tiled kernel on (rows, 128) slabs; returns (re, im) f32 slabs."""
    rows = m2d.shape[0]
    tile_r = _pick_tile_r(rows)
    grid = (pl.cdiv(rows, tile_r),)      # partial last row-block handled by Pallas
    n = rows * LANE

    in_spec = pl.BlockSpec((tile_r, LANE), lambda i: (i, 0))
    out_spec = pl.BlockSpec((tile_r, LANE), lambda i: (i, 0))

    in_bytes = (m2d.dtype.itemsize + phi2d.dtype.itemsize) * n
    out_bytes = 2 * 4 * n

    re, im = pl.pallas_call(
        _collapse_kernel,
        out_shape=(
            jax.ShapeDtypeStruct((rows, LANE), jnp.float32),
            jax.ShapeDtypeStruct((rows, LANE), jnp.float32),
        ),
        grid_spec=pltpu.PrefetchScalarGridSpec(
            num_scalar_prefetch=0,
            grid=grid,
            in_specs=[in_spec, in_spec],
            out_specs=[out_spec, out_spec],
        ),
        compiler_params=pltpu.CompilerParams(
            dimension_semantics=("parallel",),  # let v7x shard rows across both TCs
        ),
        cost_estimate=pl.CostEstimate(
            flops=32 * n,           # ~30 VPU ops/elem for fused sincos + 2 muls
            transcendentals=0,      # sincos is a VPU polynomial, not an EUP op
            bytes_accessed=in_bytes + out_bytes,
        ),
    )(m2d, phi2d)
    return re, im


def complex_collapse_planes(m: jax.Array, phi: jax.Array):
    """PRIMARY API: returns (real, imag) f32 planes of m * exp(1j*phi), input-shaped.

    Prefer this when downstream code can consume separate planes -- it avoids the
    extra HBM pass of the complex64 interleave in `complex_collapse`.
    """
    assert m.shape == phi.shape, "magnitude and phase must have the same shape"
    orig_shape = m.shape
    n = m.size
    if n == 0:
        z = jnp.zeros(orig_shape, jnp.float32)
        return z, z

    m_flat = m.reshape(-1)
    phi_flat = phi.reshape(-1)

    n_main = (n // LANE) * LANE
    tail = n - n_main

    # Fast path (covers the test and nearly all conv feature maps): zero padding,
    # zero slicing -- the flat arrays reshape (free) straight into (rows, 128).
    if tail == 0:
        rows = n_main // LANE
        re, im = _collapse_planes_2d(m_flat.reshape(rows, LANE),
                                     phi_flat.reshape(rows, LANE))
        return re.reshape(orig_shape), im.reshape(orig_shape)

    # Ragged path: kernel on the lane-aligned prefix, tiny jnp epilogue on the
    # < 128-element tail.  No full-array jnp.pad of the inputs.
    # TODO(synk): a fully pass-free ragged path needs in-kernel tail masking via a
    # scalar-prefetch length; the prefix slice + concat below still costs ~1 extra pass.
    re_parts, im_parts = [], []
    if n_main:
        rows = n_main // LANE
        re_main, im_main = _collapse_planes_2d(m_flat[:n_main].reshape(rows, LANE),
                                               phi_flat[:n_main].reshape(rows, LANE))
        re_parts.append(re_main.reshape(-1))
        im_parts.append(im_main.reshape(-1))
    m_t = m_flat[n_main:].astype(jnp.float32)
    phi_t = phi_flat[n_main:].astype(jnp.float32)
    re_parts.append(m_t * jnp.cos(phi_t))
    im_parts.append(m_t * jnp.sin(phi_t))

    re = re_parts[0] if len(re_parts) == 1 else jnp.concatenate(re_parts)
    im = im_parts[0] if len(im_parts) == 1 else jnp.concatenate(im_parts)
    return re.reshape(orig_shape), im.reshape(orig_shape)


def complex_collapse(m: jax.Array, phi: jax.Array) -> jax.Array:
    """Pallas implementation of ComplexCollapse.forward: returns m * exp(1j*phi)."""
    re, im = complex_collapse_planes(m, phi)
    # TODO(synk): TPU Pallas has no complex dtype and JAX has no complex bitcast, so
    # the re/im -> complex64 interleave stays as one XLA elementwise pass; use
    # complex_collapse_planes() when the caller can consume planes to avoid it.
    return jax.lax.complex(re, im)


if __name__ == "__main__":
    key = jax.random.PRNGKey(0)
    k_m, k_phi = jax.random.split(key)

    # Small NCHW-shaped inputs consistent with the module's usage in a conv AE.
    N, C, H, W = 2, 4, 16, 16
    m = jax.random.uniform(k_m, (N, C, H, W), dtype=jnp.float32)              # magnitudes
    phi = jax.random.uniform(k_phi, (N, C, H, W), dtype=jnp.float32,
                             minval=-math.pi, maxval=math.pi)                 # phases

    out = jax.jit(complex_collapse)(m, phi)
    out = jax.block_until_ready(out)

    ref = m.astype(jnp.complex64) * jnp.exp(1j * phi.astype(jnp.complex64))
    assert out.shape == (N, C, H, W)
    assert out.dtype == jnp.complex64
    assert jnp.max(jnp.abs(out - ref)) < 1e-5

    # Ragged-size check (exercises the aligned-prefix kernel + jnp tail epilogue).
    m2 = jax.random.uniform(k_m, (2, 3, 67), dtype=jnp.float32)
    phi2 = jax.random.uniform(k_phi, (2, 3, 67), dtype=jnp.float32,
                              minval=-math.pi, maxval=math.pi)
    out2 = jax.block_until_ready(jax.jit(complex_collapse)(m2, phi2))
    ref2 = m2.astype(jnp.complex64) * jnp.exp(1j * phi2.astype(jnp.complex64))
    assert jnp.max(jnp.abs(out2 - ref2)) < 1e-5

    print("KERNEL_OK")
</pallas_src>

<mosaic_0001>
module attributes {stable_mosaic.version = 11 : i64} {
  func.func @_collapse_kernel(%arg0: i32, %arg1: memref<8x128xf32, #tpu.memory_space<vmem>>, %arg2: memref<8x128xf32, #tpu.memory_space<vmem>>, %arg3: memref<8x128xf32, #tpu.memory_space<vmem>>, %arg4: memref<8x128xf32, #tpu.memory_space<vmem>>) attributes {dimension_semantics = [#tpu.dimension_semantics<parallel>], iteration_bounds = array<i64: 2>, scalar_prefetch = 0 : i64, scratch_operands = 0 : i64, tpu.core_type = #tpu.core_type<tc>, window_params = [{transform_indices = @transform_0, window_bounds = array<i64: 8, 128>}, {transform_indices = @transform_1, window_bounds = array<i64: 8, 128>}, {transform_indices = @transform_2, window_bounds = array<i64: 8, 128>}, {transform_indices = @transform_3, window_bounds = array<i64: 8, 128>}]} {
    %c0 = arith.constant 0 : index
    %c0_0 = arith.constant 0 : index
    %0 = vector.load %arg1[%c0, %c0_0] : memref<8x128xf32, #tpu.memory_space<vmem>>, vector<8x128xf32>
    %c0_1 = arith.constant 0 : index
    %c0_2 = arith.constant 0 : index
    %1 = vector.load %arg2[%c0_1, %c0_2] : memref<8x128xf32, #tpu.memory_space<vmem>>, vector<8x128xf32>
    %cst = arith.constant 0.636619746 : f32
    %2 = vector.broadcast %cst : f32 to vector<8x128xf32>
    %3 = arith.mulf %1, %2 : vector<8x128xf32>
    %cst_3 = arith.constant 5.000000e-01 : f32
    %4 = vector.broadcast %cst_3 : f32 to vector<8x128xf32>
    %5 = arith.addf %3, %4 : vector<8x128xf32>
    %6 = math.floor %5 : vector<8x128xf32>
    %cst_4 = arith.constant 1.5703125 : f32
    %7 = vector.broadcast %cst_4 : f32 to vector<8x128xf32>
    %8 = arith.mulf %6, %7 : vector<8x128xf32>
    %9 = arith.subf %1, %8 : vector<8x128xf32>
    %cst_5 = arith.constant 4.83751297E-4 : f32
    %10 = vector.broadcast %cst_5 : f32 to vector<8x128xf32>
    %11 = arith.mulf %6, %10 : vector<8x128xf32>
    %12 = arith.subf %9, %11 : vector<8x128xf32>
    %cst_6 = arith.constant 7.549790e-08 : f32
    %13 = vector.broadcast %cst_6 : f32 to vector<8x128xf32>
    %14 = arith.mulf %6, %13 : vector<8x128xf32>
    %15 = arith.subf %12, %14 : vector<8x128xf32>
    %16 = arith.mulf %15, %15 : vector<8x128xf32>
    %cst_7 = arith.constant -1.95152956E-4 : f32
    %17 = vector.broadcast %cst_7 : f32 to vector<8x128xf32>
    %18 = arith.mulf %17, %16 : vector<8x128xf32>
    %cst_8 = arith.constant 0.00833216123 : f32
    %19 = vector.broadcast %cst_8 : f32 to vector<8x128xf32>
    %20 = arith.addf %18, %19 : vector<8x128xf32>
    %21 = arith.mulf %20, %16 : vector<8x128xf32>
    %cst_9 = arith.constant 0.166666552 : f32
    %22 = vector.broadcast %cst_9 : f32 to vector<8x128xf32>
    %23 = arith.subf %21, %22 : vector<8x128xf32>
    %24 = arith.mulf %23, %16 : vector<8x128xf32>
    %25 = arith.mulf %24, %15 : vector<8x128xf32>
    %26 = arith.addf %25, %15 : vector<8x128xf32>
    %cst_10 = arith.constant 2.44331568E-5 : f32
    %27 = vector.broadcast %cst_10 : f32 to vector<8x128xf32>
    %28 = arith.mulf %27, %16 : vector<8x128xf32>
    %cst_11 = arith.constant 0.00138873165 : f32
    %29 = vector.broadcast %cst_11 : f32 to vector<8x128xf32>
    %30 = arith.subf %28, %29 : vector<8x128xf32>
    %31 = arith.mulf %30, %16 : vector<8x128xf32>
    %cst_12 = arith.constant 0.0416666456 : f32
    %32 = vector.broadcast %cst_12 : f32 to vector<8x128xf32>
    %33 = arith.addf %31, %32 : vector<8x128xf32>
    %34 = arith.mulf %33, %16 : vector<8x128xf32>
    %35 = arith.mulf %34, %16 : vector<8x128xf32>
    %cst_13 = arith.constant 5.000000e-01 : f32
    %36 = vector.broadcast %cst_13 : f32 to vector<8x128xf32>
    %37 = arith.mulf %36, %16 : vector<8x128xf32>
    %38 = arith.subf %35, %37 : vector<8x128xf32>
    %cst_14 = arith.constant 1.000000e+00 : f32
    %39 = vector.broadcast %cst_14 : f32 to vector<8x128xf32>
    %40 = arith.addf %38, %39 : vector<8x128xf32>
    %41 = arith.fptosi %6 : vector<8x128xf32> to vector<8x128xi32>
    %c1_i32 = arith.constant 1 : i32
    %42 = vector.broadcast %c1_i32 : i32 to vector<8x128xi32>
    %43 = arith.andi %41, %42 : vector<8x128xi32>
    %c1_i32_15 = arith.constant 1 : i32
    %44 = vector.broadcast %c1_i32_15 : i32 to vector<8x128xi32>
    %45 = arith.cmpi eq, %43, %44 : vector<8x128xi32>
    %46 = arith.select %45, %40, %26 : vector<8x128xi1>, vector<8x128xf32>
    %47 = arith.select %45, %26, %40 : vector<8x128xi1>, vector<8x128xf32>
    %c2_i32 = arith.constant 2 : i32
    %48 = vector.broadcast %c2_i32 : i32 to vector<8x128xi32>
    %49 = arith.andi %41, %48 : vector<8x128xi32>
    %c2_i32_16 = arith.constant 2 : i32
    %50 = vector.broadcast %c2_i32_16 : i32 to vector<8x128xi32>
    %51 = arith.cmpi eq, %49, %50 : vector<8x128xi32>
    %c1_i32_17 = arith.constant 1 : i32
    %52 = vector.broadcast %c1_i32_17 : i32 to vector<8x128xi32>
    %53 = arith.addi %41, %52 : vector<8x128xi32>
    %c2_i32_18 = arith.constant 2 : i32
    %54 = vector.broadcast %c2_i32_18 : i32 to vector<8x128xi32>
    %55 = arith.andi %53, %54 : vector<8x128xi32>
    %c2_i32_19 = arith.constant 2 : i32
    %56 = vector.broadcast %c2_i32_19 : i32 to vector<8x128xi32>
    %57 = arith.cmpi eq, %55, %56 : vector<8x128xi32>
    %cst_20 = arith.constant 0.000000e+00 : f32
    %58 = vector.broadcast %cst_20 : f32 to vector<8x128xf32>
    %59 = arith.subf %58, %46 : vector<8x128xf32>
    %60 = arith.select %51, %59, %46 : vector<8x128xi1>, vector<8x128xf32>
    %cst_21 = arith.constant 0.000000e+00 : f32
    %61 = vector.broadcast %cst_21 : f32 to vector<8x128xf32>
    %62 = arith.subf %61, %47 : vector<8x128xf32>
    %63 = arith.select %57, %62, %47 : vector<8x128xi1>, vector<8x128xf32>
    %64 = arith.mulf %0, %63 : vector<8x128xf32>
    %c0_22 = arith.constant 0 : index
    %c0_23 = arith.constant 0 : index
    %65 = vector.load %arg3[%c0_22, %c0_23] : memref<8x128xf32, #tpu.memory_space<vmem>>, vector<8x128xf32>
    tpu.vector_store %arg3[%c0_22, %c0_23], %64 {strides = array<i32>} : memref<8x128xf32, #tpu.memory_space<vmem>>, vector<8x128xf32>,
    %66 = arith.mulf %0, %60 : vector<8x128xf32>
    %c0_24 = arith.constant 0 : index
    %c0_25 = arith.constant 0 : index
    %67 = vector.load %arg4[%c0_24, %c0_25] : memref<8x128xf32, #tpu.memory_space<vmem>>, vector<8x128xf32>
    tpu.vector_store %arg4[%c0_24, %c0_25], %66 {strides = array<i32>} : memref<8x128xf32, #tpu.memory_space<vmem>>, vector<8x128xf32>,
    return
  }
  func.func @transform_0(%arg0: i32) -> (i32, i32) {
    %c0_i32 = arith.constant 0 : i32
    %c0_i32_0 = arith.constant 0 : i32
    return %arg0, %c0_i32 : i32, i32
  }
  func.func @transform_1(%arg0: i32) -> (i32, i32) {
    %c0_i32 = arith.constant 0 : i32
    %c0_i32_0 = arith.constant 0 : i32
    return %arg0, %c0_i32 : i32, i32
  }
  func.func @transform_2(%arg0: i32) -> (i32, i32) {
    %c0_i32 = arith.constant 0 : i32
    %c0_i32_0 = arith.constant 0 : i32
    return %arg0, %c0_i32 : i32, i32
  }
  func.func @transform_3(%arg0: i32) -> (i32, i32) {
    %c0_i32 = arith.constant 0 : i32
    %c0_i32_0 = arith.constant 0 : i32
    return %arg0, %c0_i32 : i32, i32
  }
}

</mosaic_0001>

<bundles_post_ra>
// kernel: custom-call
= control target key start
LH: loop header
LB: loop body
LE: loop exit
PB: predicated region body
PF: predicated region fallthrough
CT: control target
= control target key end

     0   :  { %s126_s0 = inlined_call_operand.vmem [shape: f32[2,4,16,16], index: 0, kind: input, shape index: {}]   ;;  %s127_s1 = inlined_call_operand.vmem [shape: f32[2,4,16,16], index: 1, kind: input, shape index: {}]   ;;  %s128_s2 = inlined_call_operand.hbm [shape: c64[2,4,16,16], index: 2, kind: output, shape index: {}]  }
   0x1   :  { %s87_s11 = scalar_lea.hbm %s128_s2, 2048 }
   0x2   :  { %4 = vsyncpa [#allocation0], 0  ;;  %s5_s14 = sshll.u32 %s126_s0, 4  ;;  %s6_s14 = int_to_ptr.vmem [resolvable:$true] %s5_s14 }
   0x3   :  { %s18_s15 = scalar_lea.vmem %s6_s14, 2048  ;;  %p23_p1 = scmp.lt.s32.totalorder %s6_s14, %s6_s14 }
   0x4   :  { %p19_p0 = scmp.ne.s32.totalorder %s6_s14, %s18_s15  ;;  %p24_p2 = scmp.lt.s32.totalorder %s18_s15, %s18_s15 }
   0x6   :  { %p25_p3 = por %p24_p2, %p23_p1 }
   0x8   :  { %p26_p4 = pnand %p25_p3, %p19_p0 }
   0xa   :  { %29 = shalt.err (!%p26_p4)  }
   0xb   :  { %p31_p5 = scmp.ne.s32.totalorder %s128_s2, %s87_s11  ;;  %s32_s0 = scalar_lea.hbm %s128_s2, 4096 }
   0xc   :  { %p33_p6 = scmp.lt.u32.totalorder %s32_s0, %s87_s11  ;;  %p34_p7 = scmp.lt.u32.totalorder %s87_s11, %s128_s2 }
   0xe   :  { %p35_p8 = por %p34_p7, %p33_p6 }
  0x10   :  { %p36_p9 = pnand %p35_p8, %p31_p5 }
  0x12   :  { %39 = shalt.err (!%p36_p9)  }
  0x13   :  { %8 = dma.vmem_to_hbm [thread:$0]  %s6_s14, 2048, %s128_s2, [#allocation0] }
  0x14   :  { %65 = dma.done.wait [#allocation0], 2048  }
  0x15   :  { %66 = vsyncadd [#allocation0], 4294965248 }
  0x16   :  { %10 = vsyncpa [#allocation0], 1 }
  0x17   :  { %11 = vsyncpa [#allocation1], 0  ;;  %s12_s28 = sshll.u32 %s127_s1, 4  ;;  %s13_s28 = int_to_ptr.vmem [resolvable:$true] %s12_s28 }
  0x18   :  { %s40_s29 = scalar_lea.vmem %s13_s28, 2048  ;;  %p45_p11 = scmp.lt.s32.totalorder %s13_s28, %s13_s28 }
  0x19   :  { %p41_p10 = scmp.ne.s32.totalorder %s13_s28, %s40_s29  ;;  %p46_p12 = scmp.lt.s32.totalorder %s40_s29, %s40_s29 }
  0x1b   :  { %p47_p13 = por %p46_p12, %p45_p11 }
  0x1d   :  { %p48_p0 = pnand %p47_p13, %p41_p10 }
  0x1f   :  { %51 = shalt.err (!%p48_p0)  }
  0x20   :  { %p53_p1 = scmp.ne.s32.totalorder %s87_s11, %s32_s0  ;;  %p56_p2 = scmp.lt.u32.totalorder %s32_s0, %s32_s0 }
  0x22   :  { %p57_p3 = por %p56_p2, %p34_p7 }
  0x24   :  { %p59_p4 = por %p57_p3, %p33_p6 }
  0x26   :  { %p60_p5 = pnand %p59_p4, %p53_p1 }
  0x28   :  { %63 = shalt.err (!%p60_p5)  }
  0x29   :  { %15 = dma.vmem_to_hbm [thread:$0]  %s13_s28, 2048, %s87_s11, [#allocation1] }
  0x2a   :  { %67 = dma.done.wait [#allocation1], 2048  }
  0x2b   :  { %68 = vsyncadd [#allocation1], 4294965248 }
  0x2c   :  { %17 = vsyncpa [#allocation1], 1 }

// kernel: complex_collapse.1
= control target key start
LH: loop header
LB: loop body
LE: loop exit
PB: predicated region body
PF: predicated region fallthrough
CT: control target
= control target key end

     0   :  { %s387_s12 = smov 0   ;;  %s416_s0 = inlined_call_operand.vmem [shape: f32[16,128], index: 0, kind: input, shape index: {}]   ;;  %s417_s1 = inlined_call_operand.vmem [shape: f32[16,128], index: 1, kind: input, shape index: {}]   ;;  %s418_s2 = inlined_call_operand.vmem [shape: f32[16,128], index: 2, kind: output, shape index: {0}]   ;;  %s419_s3 = inlined_call_operand.vmem [shape: f32[16,128], index: 3, kind: output, shape index: {1}]  }
   0x1 LB: > { %s336_s13 = sadd.s32 4294967295, %s365_s12   ;;  %p340_p0 = scmp.ge.s32.totalorder %s365_s12, 1  ;;  %s365_s12 = sphi %s387_s12, %s14_s12  }
   0x2   : > { %p148_p1 = scmp.lt.s32.totalorder %s365_s12, 3 }
   0x4   : > { %p149_p2 = pnand %p340_p0, %p148_p1 }
   0x5   : > { %p178_p3 = scmp.lt.s32.totalorder (!%p149_p2), %s336_s13, 1 }
   0x6   : > { %152 = sbr.rel (%p149_p2) target bundleno = 56 (0x38), region = 28 }
   0xd   : > { %s421_s13 = smov (!%p178_p3, %s336_s13), 1 }
   0xe   : > { %s395_s14 = sshll.u32 %s421_s13, 3 }
   0xf   : > { %s185_s17 = scalar_lea.vmem %s417_s1, %s395_s14  ;;  %s181_s20 = scalar_lea.vmem %s416_s0, %s395_s14 }
  0x10   : > { %v195_v0 = vld [vmem:[%s185_s17] sm:$0xff]  ;;  %s189_s23 = scalar_lea.vmem %s418_s2, %s395_s14  ;;  %s193_s26 = scalar_lea.vmem %s419_s3, %s395_s14 }
  0x11   : > { %v196_v1 = vmul.f32 0.63661975, %v195_v0  ;;  %v194_v35 = vld [vmem:[%s181_s20] sm:$0xff] }
  0x13   : > { %v197_v2 = vadd.f32 0.5, %v196_v1 }
  0x15   : > { %v198_v3 = vfloor.f32 %v197_v2 }
  0x17   : > { %v199_v4 = vmul.f32 1.5703125, %v198_v3  ;;  %v201_v5 = vmul.f32 0.0004837513, %v198_v3  ;;  %v203_v7 = vmul.f32 7.54979e-08, %v198_v3  ;;  %v349_v13 = vtrunc.f32 %v198_v3 }
  0x19   : > { %v200_v6 = vsub.f32 %v195_v0, %v199_v4  ;;  %v350_v18 = vcvt.f32.s32 %v349_v13 }
  0x1b   : > { %v202_v8 = vsub.f32 %v200_v6, %v201_v5  ;;  %v229_v24 = vadd.s32 1, %v350_v18  ;;  %v223_v25 = vand.u32 1, %v350_v18  ;;  %v227_v31 = vand.u32 2, %v350_v18 }
  0x1d   : > { %v204_v9 = vsub.f32 %v202_v8, %v203_v7  ;;  %v230_v30 = vand.u32 2, %v229_v24  ;;  %vm224_vm0 = vcmp.eq.s32.totalorder %v223_v25, 1  ;;  %vm228_vm2 = vcmp.eq.s32.totalorder %v227_v31, 2 }
  0x1f   : > { %v205_v10 = vmul.f32 %v204_v9, %v204_v9  ;;  %vm231_vm1 = vcmp.eq.s32.totalorder %v230_v30, 2 }
  0x21   : > { %v206_v11 = vmul.f32 -0.00019515296, %v205_v10  ;;  %v213_v12 = vmul.f32 2.4433157e-05, %v205_v10  ;;  %v219_v23 = vmul.f32 0.5, %v205_v10 }
  0x23   : > { %v207_v14 = vadd.f32 0.008332161, %v206_v11  ;;  %v346_v15 = vadd.f32 -0.0013887316, %v213_v12 }
  0x25   : > { %v208_v16 = vmul.f32 %v207_v14, %v205_v10  ;;  %v215_v17 = vmul.f32 %v346_v15, %v205_v10 }
  0x27   : > { %v345_v19 = vadd.f32 -0.16666655, %v208_v16  ;;  %v216_v20 = vadd.f32 0.041666646, %v215_v17 }
  0x29   : > { %v210_v21 = vmul.f32 %v345_v19, %v205_v10  ;;  %v217_v22 = vmul.f32 %v216_v20, %v205_v10 }
  0x2b   : > { %v211_v26 = vmul.f32 %v210_v21, %v204_v9  ;;  %v218_v27 = vmul.f32 %v217_v22, %v205_v10 }
  0x2d   : > { %v212_v28 = vadd.f32 %v211_v26, %v204_v9  ;;  %v220_v29 = vsub.f32 %v218_v27, %v219_v23 }
  0x2f   : > { %v221_v32 = vadd.f32 1.0, %v220_v29 }
  0x31   : > { %v226_v33 = vsel %vm224_vm0, %v212_v28, %v221_v32  ;;  %v225_v34 = vsel %vm224_vm0, %v221_v32, %v212_v28 }
  0x32   : > { %v234_v36 = vsub.f32 0.0, %v226_v33  ;;  %v232_v37 = vsub.f32 0.0, %v225_v34 }
  0x34   : > { %v235_v38 = vsel %vm231_vm1, %v234_v36, %v226_v33  ;;  %v233_v39 = vsel %vm228_vm2, %v232_v37, %v225_v34 }
  0x35   : > { %v236_v40 = vmul.f32 %v235_v38, %v194_v35  ;;  %v238_v41 = vmul.f32 %v233_v39, %v194_v35 }
  0x37   : > { %237 = vst [vmem:[%s189_s23] sm:$0xff] %v236_v40  ;;  %239 = vst [vmem:[%s193_s26] sm:$0xff] %v238_v41 }
  0x38 PF: > { %s14_s12 = sadd.s32 1, %s365_s12  }
  0x39   : > { %p11_p4 = scmp.ge.s32.totalorder %s14_s12, 4  }
  0x3b   :  { %13 = sbr.rel (!%p11_p4) target bundleno = 1 (0x1), region = 73 }

</bundles_post_ra>
